<compile_context>
chip_gen: v7x
topology: tpu7x:2x2x1
jax: 0.10.0
libtpu: 0.0.40
codegen_flags: <defaults>
</compile_context>

<pallas_src>
import jax
import jax.numpy as jnp
from jax.experimental import pallas as pl
from jax.experimental.pallas import tpu as pltpu

_LANES = 128  # lane-dense padded width of the 2-class output


def _search_head_kernel(last_pos_ref,   # SMEM [B] int32: last <eos> pos per row
                        hs_ref,         # HBM  [B, S, H] (memory_space=ANY)
                        w1_ref, b1_ref,  # VMEM [H, H], [1, H]   (resident)
                        w2_ref, b2_ref,  # VMEM [H, 128], [1, 128] (resident)
                        logits_ref,      # VMEM [TB, 128] output block
                        vec_ref,         # VMEM [TB, H] scratch (native dtype)
                        dma_sems):       # DMA sems (TB,)
    tb = vec_ref.shape[0]
    b0 = pl.program_id(0) * tb

    # 1) Gather: one small DMA per batch row — only the last-<eos> hidden state.
    copies = []
    for j in range(tb):
        lp = last_pos_ref[b0 + j]
        cp = pltpu.make_async_copy(
            hs_ref.at[b0 + j, pl.ds(lp, 1), :],   # (1, H) row in HBM
            vec_ref.at[pl.ds(j, 1), :],           # (1, H) slot in VMEM
            dma_sems.at[j])
        cp.start()
        copies.append(cp)
    for cp in copies:
        cp.wait()

    # 2) RobertaClassificationHead on the pooled [TB, H] tile.
    #    Only the tiny pooled vector is cast; weights feed the MXU directly.
    vec = vec_ref[...].astype(jnp.float32)
    h = jnp.tanh(
        jnp.dot(vec, w1_ref[...], preferred_element_type=jnp.float32)
        + b1_ref[...])
    logits_ref[...] = (
        jnp.dot(h, w2_ref[...], preferred_element_type=jnp.float32)
        + b2_ref[...]).astype(logits_ref.dtype)


def search_model_forward(source_ids, hidden_states, params, eos_token_id,
                         labels=None, batch_tile=None):
    """Equivalent of SearchModel.forward given the encoder hidden states."""
    B, S = source_ids.shape
    H = hidden_states.shape[-1]

    # --- eos bookkeeping on the scalar/XLA side (kept off the vector path) ---
    iota = jnp.arange(S, dtype=jnp.int32)[None, :]
    eos_mask = source_ids == eos_token_id
    last_pos = jnp.max(jnp.where(eos_mask, iota, -1), axis=1).astype(jnp.int32)
    # Guard rows without <eos> (torch would raise earlier); clamp keeps DMA in bounds.
    last_pos = jnp.clip(last_pos, 0, S - 1)

    # --- pad out_proj to 128 lanes for a lane-dense output store ---
    w2p = jnp.zeros((H, _LANES), params["w2"].dtype).at[:, :2].set(params["w2"])
    b2p = jnp.zeros((1, _LANES), params["b2"].dtype).at[:, :2].set(params["b2"])

    tb = B if batch_tile is None else min(batch_tile, B)
    assert B % tb == 0, "batch must be divisible by the batch tile"
    grid = (B // tb,)

    logits_padded = pl.pallas_call(
        _search_head_kernel,
        grid=grid,
        out_shape=jax.ShapeDtypeStruct((B, _LANES), jnp.float32),
        in_specs=[
            pl.BlockSpec(memory_space=pltpu.MemorySpace.SMEM),   # last_pos
            pl.BlockSpec(memory_space=pl.ANY),                   # hidden_states (stay in HBM)
            pl.BlockSpec(memory_space=pltpu.MemorySpace.VMEM),   # w1 (resident across grid)
            pl.BlockSpec(memory_space=pltpu.MemorySpace.VMEM),   # b1
            pl.BlockSpec(memory_space=pltpu.MemorySpace.VMEM),   # w2 padded
            pl.BlockSpec(memory_space=pltpu.MemorySpace.VMEM),   # b2 padded
        ],
        out_specs=pl.BlockSpec((tb, _LANES), lambda i: (i, 0)),
        scratch_shapes=[
            pltpu.VMEM((tb, H), hidden_states.dtype),            # pooled rows, native dtype
            pltpu.SemaphoreType.DMA((tb,)),
        ],
        compiler_params=pltpu.CompilerParams(
            dimension_semantics=("parallel",)),                  # megacore-friendly batch grid
    )(last_pos, hidden_states, params["w1"], params["b1"], w2p, b2p)

    logits = logits_padded[:, :2]

    if labels is not None:
        # CrossEntropyLoss (mean reduction) — tiny [B,2] tensor, plain JAX glue.
        logp = jax.nn.log_softmax(logits, axis=-1)
        loss = -jnp.mean(jnp.take_along_axis(logp, labels[:, None], axis=1))
        return loss, logits
    return logits


def _reference_forward(source_ids, hidden_states, params, eos_token_id):
    """Pure-JAX reference mirroring the torch semantics."""
    B, S = source_ids.shape
    iota = jnp.arange(S)[None, :]
    last = jnp.max(jnp.where(source_ids == eos_token_id, iota, -1), axis=1)
    last = jnp.clip(last, 0, S - 1)
    vec = hidden_states[jnp.arange(B), last, :]
    h = jnp.tanh(vec @ params["w1"] + params["b1"])
    return h @ params["w2"] + params["b2"]


if __name__ == "__main__":
    B, S, H = 2, 8, 128
    VOCAB = 50
    EOS_ID = 2

    key = jax.random.PRNGKey(0)
    k_ids, k_emb, k_w1, k_b1, k_w2, k_b2 = jax.random.split(key, 6)

    # Deterministic source_ids with exactly one <eos> per example (same count
    # per row, as required by SearchModel.get_t5_vec).
    source_ids = jax.random.randint(k_ids, (B, S), 3, VOCAB, dtype=jnp.int32)
    source_ids = source_ids.at[0, 5].set(EOS_ID)
    source_ids = source_ids.at[1, 7].set(EOS_ID)

    counts = jnp.sum(source_ids == EOS_ID, axis=1)
    if not bool(jnp.all(counts == counts[0])):
        raise ValueError("All examples must have the same number of <eos> tokens.")

    # TODO(synk): the T5 encoder/decoder itself is an external module and is not
    # translated; its final decoder hidden states are stood in for by a
    # deterministic embedding lookup.
    emb_table = jax.random.normal(k_emb, (VOCAB, H), dtype=jnp.float32) * 0.1
    hidden_states = emb_table[source_ids]                 # [B, S, H]

    # RobertaClassificationHead parameters, (in, out) layout.
    params = {
        "w1": jax.random.normal(k_w1, (H, H), dtype=jnp.float32) * 0.05,
        "b1": jax.random.normal(k_b1, (1, H), dtype=jnp.float32) * 0.01,
        "w2": jax.random.normal(k_w2, (H, 2), dtype=jnp.float32) * 0.05,
        "b2": jax.random.normal(k_b2, (1, 2), dtype=jnp.float32) * 0.01,
    }

    logits = search_model_forward(source_ids, hidden_states, params, EOS_ID)
    logits = jax.block_until_ready(logits)

    ref = _reference_forward(source_ids, hidden_states, params, EOS_ID)
    assert logits.shape == (B, 2)
    assert jnp.allclose(logits, ref, atol=1e-4), "mismatch vs reference"

    # Also exercise the labels branch (CrossEntropyLoss path).
    labels = jnp.array([0, 1], dtype=jnp.int32)
    loss, _ = search_model_forward(source_ids, hidden_states, params, EOS_ID,
                                   labels=labels)
    jax.block_until_ready(loss)

    print("KERNEL_OK")
</pallas_src>

<mosaic_0001>
module attributes {stable_mosaic.version = 11 : i64} {
  func.func @_search_head_kernel(%arg0: i32, %arg1: memref<2xi32, #tpu.memory_space<smem>>, %arg2: memref<2x8x128xf32, #tpu.memory_space<any>>, %arg3: memref<128x128xf32, #tpu.memory_space<vmem>>, %arg4: memref<1x128xf32, #tpu.memory_space<vmem>>, %arg5: memref<128x128xf32, #tpu.memory_space<vmem>>, %arg6: memref<1x128xf32, #tpu.memory_space<vmem>>, %arg7: memref<2x128xf32, #tpu.memory_space<vmem>>, %arg8: memref<2x128xf32, #tpu.memory_space<vmem>>, %arg9: memref<2x!tpu.dma_semaphore, #tpu.memory_space<semaphore_mem>>) attributes {dimension_semantics = [#tpu.dimension_semantics<parallel>], iteration_bounds = array<i64: 1>, scalar_prefetch = 0 : i64, scratch_operands = 2 : i64, tpu.core_type = #tpu.core_type<tc>, window_params = [{transform_indices = @transform_0, window_bounds = array<i64: 2>}, {}, {pipeline_mode = #tpu.pipeline_mode<synchronous>, transform_indices = @transform_2, window_bounds = array<i64: 128, 128>}, {pipeline_mode = #tpu.pipeline_mode<synchronous>, transform_indices = @transform_3, window_bounds = array<i64: 1, 128>}, {pipeline_mode = #tpu.pipeline_mode<synchronous>, transform_indices = @transform_4, window_bounds = array<i64: 128, 128>}, {pipeline_mode = #tpu.pipeline_mode<synchronous>, transform_indices = @transform_5, window_bounds = array<i64: 1, 128>}, {transform_indices = @transform_6, window_bounds = array<i64: 2, 128>}]} {
    %c2_i32 = arith.constant 2 : i32
    %0 = arith.muli %arg0, %c2_i32 : i32
    %c0_i32 = arith.constant 0 : i32
    %1 = arith.addi %0, %c0_i32 : i32
    %2 = arith.index_cast %1 : i32 to index
    %3 = memref.load %arg1[%2] : memref<2xi32, #tpu.memory_space<smem>>
    %c0_i32_0 = arith.constant 0 : i32
    %4 = arith.addi %0, %c0_i32_0 : i32
    %c0_i32_1 = arith.constant 0 : i32
    %c0_i32_2 = arith.constant 0 : i32
    %5 = tpu.memref_slice %arg2[%4, %3, %c0_i32_2] : memref<2x8x128xf32, #tpu.memory_space<any>> -> memref<1x1x128xf32, #tpu.memory_space<any>>
    %6 = tpu.memref_squeeze %5 : memref<1x1x128xf32, #tpu.memory_space<any>> -> memref<1x128xf32, #tpu.memory_space<any>>
    %c0_i32_3 = arith.constant 0 : i32
    %c0_i32_4 = arith.constant 0 : i32
    %7 = tpu.memref_slice %arg8[%c0_i32_3, %c0_i32_4] : memref<2x128xf32, #tpu.memory_space<vmem>> -> memref<1x128xf32, #tpu.memory_space<vmem>>
    %8 = tpu.memref_slice %arg9[%c0_i32_1] : memref<2x!tpu.dma_semaphore, #tpu.memory_space<semaphore_mem>> -> memref<1x!tpu.dma_semaphore, #tpu.memory_space<semaphore_mem>>
    %9 = tpu.memref_squeeze %8 : memref<1x!tpu.dma_semaphore, #tpu.memory_space<semaphore_mem>> -> memref<!tpu.dma_semaphore, #tpu.memory_space<semaphore_mem>>
    tpu.enqueue_dma source(%6 : memref<1x128xf32, #tpu.memory_space<any>>) target(%7 : memref<1x128xf32, #tpu.memory_space<vmem>>) target_semaphore(%9 : memref<!tpu.dma_semaphore, #tpu.memory_space<semaphore_mem>>)
    %c1_i32 = arith.constant 1 : i32
    %10 = arith.addi %0, %c1_i32 : i32
    %11 = arith.index_cast %10 : i32 to index
    %12 = memref.load %arg1[%11] : memref<2xi32, #tpu.memory_space<smem>>
    %c1_i32_5 = arith.constant 1 : i32
    %13 = arith.addi %0, %c1_i32_5 : i32
    %c1_i32_6 = arith.constant 1 : i32
    %c0_i32_7 = arith.constant 0 : i32
    %14 = tpu.memref_slice %arg2[%13, %12, %c0_i32_7] : memref<2x8x128xf32, #tpu.memory_space<any>> -> memref<1x1x128xf32, #tpu.memory_space<any>>
    %15 = tpu.memref_squeeze %14 : memref<1x1x128xf32, #tpu.memory_space<any>> -> memref<1x128xf32, #tpu.memory_space<any>>
    %c1_i32_8 = arith.constant 1 : i32
    %c0_i32_9 = arith.constant 0 : i32
    %16 = tpu.memref_slice %arg8[%c1_i32_8, %c0_i32_9] : memref<2x128xf32, #tpu.memory_space<vmem>> -> memref<1x128xf32, #tpu.memory_space<vmem>>
    %17 = tpu.memref_slice %arg9[%c1_i32_6] : memref<2x!tpu.dma_semaphore, #tpu.memory_space<semaphore_mem>> -> memref<1x!tpu.dma_semaphore, #tpu.memory_space<semaphore_mem>>
    %18 = tpu.memref_squeeze %17 : memref<1x!tpu.dma_semaphore, #tpu.memory_space<semaphore_mem>> -> memref<!tpu.dma_semaphore, #tpu.memory_space<semaphore_mem>>
    tpu.enqueue_dma source(%15 : memref<1x128xf32, #tpu.memory_space<any>>) target(%16 : memref<1x128xf32, #tpu.memory_space<vmem>>) target_semaphore(%18 : memref<!tpu.dma_semaphore, #tpu.memory_space<semaphore_mem>>)
    %c0_i32_10 = arith.constant 0 : i32
    %c0_i32_11 = arith.constant 0 : i32
    %19 = tpu.memref_slice %arg2[%4, %3, %c0_i32_11] : memref<2x8x128xf32, #tpu.memory_space<any>> -> memref<1x1x128xf32, #tpu.memory_space<any>>
    %20 = tpu.memref_squeeze %19 : memref<1x1x128xf32, #tpu.memory_space<any>> -> memref<1x128xf32, #tpu.memory_space<any>>
    %c0_i32_12 = arith.constant 0 : i32
    %c0_i32_13 = arith.constant 0 : i32
    %21 = tpu.memref_slice %arg8[%c0_i32_12, %c0_i32_13] : memref<2x128xf32, #tpu.memory_space<vmem>> -> memref<1x128xf32, #tpu.memory_space<vmem>>
    %22 = tpu.memref_slice %arg9[%c0_i32_10] : memref<2x!tpu.dma_semaphore, #tpu.memory_space<semaphore_mem>> -> memref<1x!tpu.dma_semaphore, #tpu.memory_space<semaphore_mem>>
    %23 = tpu.memref_squeeze %22 : memref<1x!tpu.dma_semaphore, #tpu.memory_space<semaphore_mem>> -> memref<!tpu.dma_semaphore, #tpu.memory_space<semaphore_mem>>
    tpu.wait_dma2 semaphore(%23 : memref<!tpu.dma_semaphore, #tpu.memory_space<semaphore_mem>>) src(%20 : memref<1x128xf32, #tpu.memory_space<any>>) dst(%21 : memref<1x128xf32, #tpu.memory_space<vmem>>)
    %c1_i32_14 = arith.constant 1 : i32
    %c0_i32_15 = arith.constant 0 : i32
    %24 = tpu.memref_slice %arg2[%13, %12, %c0_i32_15] : memref<2x8x128xf32, #tpu.memory_space<any>> -> memref<1x1x128xf32, #tpu.memory_space<any>>
    %25 = tpu.memref_squeeze %24 : memref<1x1x128xf32, #tpu.memory_space<any>> -> memref<1x128xf32, #tpu.memory_space<any>>
    %c1_i32_16 = arith.constant 1 : i32
    %c0_i32_17 = arith.constant 0 : i32
    %26 = tpu.memref_slice %arg8[%c1_i32_16, %c0_i32_17] : memref<2x128xf32, #tpu.memory_space<vmem>> -> memref<1x128xf32, #tpu.memory_space<vmem>>
    %27 = tpu.memref_slice %arg9[%c1_i32_14] : memref<2x!tpu.dma_semaphore, #tpu.memory_space<semaphore_mem>> -> memref<1x!tpu.dma_semaphore, #tpu.memory_space<semaphore_mem>>
    %28 = tpu.memref_squeeze %27 : memref<1x!tpu.dma_semaphore, #tpu.memory_space<semaphore_mem>> -> memref<!tpu.dma_semaphore, #tpu.memory_space<semaphore_mem>>
    tpu.wait_dma2 semaphore(%28 : memref<!tpu.dma_semaphore, #tpu.memory_space<semaphore_mem>>) src(%25 : memref<1x128xf32, #tpu.memory_space<any>>) dst(%26 : memref<1x128xf32, #tpu.memory_space<vmem>>)
    %c0 = arith.constant 0 : index
    %c0_18 = arith.constant 0 : index
    %29 = vector.load %arg8[%c0, %c0_18] : memref<2x128xf32, #tpu.memory_space<vmem>>, vector<2x128xf32>
    %c0_19 = arith.constant 0 : index
    %c0_20 = arith.constant 0 : index
    %30 = vector.load %arg3[%c0_19, %c0_20] : memref<128x128xf32, #tpu.memory_space<vmem>>, vector<128x128xf32>
    %cst = arith.constant dense<0.000000e+00> : vector<2x128xf32>
    %31 = tpu.matmul %29, %30, %cst {dimension_numbers = #tpu.dot_dimension_numbers<[1], [0], [0], [1], [0, 0, 1, 1], [], []>} : vector<2x128xf32>, vector<128x128xf32>, vector<2x128xf32> -> vector<2x128xf32>
    %c0_21 = arith.constant 0 : index
    %c0_22 = arith.constant 0 : index
    %32 = vector.load %arg4[%c0_21, %c0_22] : memref<1x128xf32, #tpu.memory_space<vmem>>, vector<1x128xf32>
    %33 = vector.broadcast %32 : vector<1x128xf32> to vector<2x128xf32>
    %34 = arith.addf %31, %33 : vector<2x128xf32>
    %35 = math.tanh %34 : vector<2x128xf32>
    %c0_23 = arith.constant 0 : index
    %c0_24 = arith.constant 0 : index
    %36 = vector.load %arg5[%c0_23, %c0_24] : memref<128x128xf32, #tpu.memory_space<vmem>>, vector<128x128xf32>
    %cst_25 = arith.constant dense<0.000000e+00> : vector<2x128xf32>
    %37 = tpu.matmul %35, %36, %cst_25 {dimension_numbers = #tpu.dot_dimension_numbers<[1], [0], [0], [1], [0, 0, 1, 1], [], []>} : vector<2x128xf32>, vector<128x128xf32>, vector<2x128xf32> -> vector<2x128xf32>
    %c0_26 = arith.constant 0 : index
    %c0_27 = arith.constant 0 : index
    %38 = vector.load %arg6[%c0_26, %c0_27] : memref<1x128xf32, #tpu.memory_space<vmem>>, vector<1x128xf32>
    %39 = vector.broadcast %38 : vector<1x128xf32> to vector<2x128xf32>
    %40 = arith.addf %37, %39 : vector<2x128xf32>
    %c0_28 = arith.constant 0 : index
    %c0_29 = arith.constant 0 : index
    %41 = vector.load %arg7[%c0_28, %c0_29] : memref<2x128xf32, #tpu.memory_space<vmem>>, vector<2x128xf32>
    tpu.vector_store %arg7[%c0_28, %c0_29], %40 {strides = array<i32>} : memref<2x128xf32, #tpu.memory_space<vmem>>, vector<2x128xf32>,
    return
  }
  func.func @transform_0(%arg0: i32) -> i32 {
    %c0_i32 = arith.constant 0 : i32
    %c0_i32_0 = arith.constant 0 : i32
    return %c0_i32 : i32
  }
  func.func @transform_2(%arg0: i32) -> (i32, i32) {
    %c0_i32 = arith.constant 0 : i32
    %c0_i32_0 = arith.constant 0 : i32
    %c0_i32_1 = arith.constant 0 : i32
    return %c0_i32, %c0_i32_0 : i32, i32
  }
  func.func @transform_3(%arg0: i32) -> (i32, i32) {
    %c0_i32 = arith.constant 0 : i32
    %c0_i32_0 = arith.constant 0 : i32
    %c0_i32_1 = arith.constant 0 : i32
    return %c0_i32, %c0_i32_0 : i32, i32
  }
  func.func @transform_4(%arg0: i32) -> (i32, i32) {
    %c0_i32 = arith.constant 0 : i32
    %c0_i32_0 = arith.constant 0 : i32
    %c0_i32_1 = arith.constant 0 : i32
    return %c0_i32, %c0_i32_0 : i32, i32
  }
  func.func @transform_5(%arg0: i32) -> (i32, i32) {
    %c0_i32 = arith.constant 0 : i32
    %c0_i32_0 = arith.constant 0 : i32
    %c0_i32_1 = arith.constant 0 : i32
    return %c0_i32, %c0_i32_0 : i32, i32
  }
  func.func @transform_6(%arg0: i32) -> (i32, i32) {
    %c0_i32 = arith.constant 0 : i32
    %c0_i32_0 = arith.constant 0 : i32
    return %arg0, %c0_i32 : i32, i32
  }
}

</mosaic_0001>

<bundles_post_ra>
// kernel: tpu_custom_call.1
= control target key start
LH: loop header
LB: loop body
LE: loop exit
PB: predicated region body
PF: predicated region fallthrough
CT: control target
= control target key end

     0   :  { %11 = vsyncpa [#allocation7], 0  ;;  %s784_s0 = inlined_call_operand.hbm [shape: s32[2], index: 0, kind: input, shape index: {}]   ;;  %s785_s1 = inlined_call_operand.hbm [shape: f32[2,8,128], index: 1, kind: input, shape index: {}]   ;;  %s786_s2 = inlined_call_operand.hbm [shape: f32[128,128], index: 2, kind: input, shape index: {}]   ;;  %s787_s3 = inlined_call_operand.vmem [shape: f32[1,128], index: 3, kind: input, shape index: {}]   ;;  %s788_s4 = inlined_call_operand.hbm [shape: f32[128,128], index: 4, kind: input, shape index: {}]   ;;  %s789_s5 = inlined_call_operand.vmem [shape: f32[1,128], index: 5, kind: input, shape index: {}]   ;;  %s790_s6 = inlined_call_operand.hbm [shape: f32[2,128], index: 6, kind: output, shape index: {}]  }
   0x1   :  { %12 = vsyncpa [#allocation5], 0 }
   0x2   :  { %13 = vsyncpa [#allocation10], 0 }
   0x3   :  { %14 = vsyncpa [#allocation6], 0  ;;  %s498_s23 = scalar_lea.hbm %s784_s0, 16 }
   0x4   :  { %p499_p0 = scmp.ne.s32.totalorder %s784_s0, %s498_s23  ;;  %p502_p1 = scmp.lt.u32.totalorder %s498_s23, %s784_s0 }
   0x6   :  { %p504_p2 = pnand %p502_p1, %p499_p0 }
   0x8   :  { %507 = shalt.err (!%p504_p2)
}
   0x9   :  { %s635_s28 = smov [#allocation4]   ;;  %s636_s7 = smov [#allocation8]  }
   0xa   :  { %22 = dma.hbm_to_smem %s784_s0, 16, %s635_s28, [#allocation7]  }
   0xb   :  { %s28_s8 = sshll.u32 %s636_s7, 4  ;;  %s508_s11 = scalar_lea.hbm %s786_s2, 2048  ;;  %s29_s8 = int_to_ptr.vmem [resolvable:$true] %s28_s8 }
   0xc   :  { %p509_p3 = scmp.ne.s32.totalorder %s786_s2, %s508_s11  ;;  %p512_p4 = scmp.lt.u32.totalorder %s508_s11, %s786_s2 }
   0xe   :  { %p514_p5 = pnand %p512_p4, %p509_p3 }
  0x10   :  { %517 = shalt.err (!%p514_p5)
}
  0x11   :  { %s518_s16 = scalar_lea.vmem %s29_s8, 2048  ;;  %p523_p7 = scmp.lt.s32.totalorder %s29_s8, %s29_s8 }
  0x12   :  { %p519_p6 = scmp.ne.s32.totalorder %s29_s8, %s518_s16  ;;  %p524_p8 = scmp.lt.s32.totalorder %s518_s16, %s518_s16 }
  0x14   :  { %p525_p9 = por %p524_p8, %p523_p7 }
  0x16   :  { %p526_p10 = pnand %p525_p9, %p519_p6 }
  0x18   :  { %529 = shalt.err (!%p526_p10)
}
  0x19   :  { %s637_s0 = smov 128   ;;  %s638_s17 = smov 8  }
  0x1a   :  { %34 = dma.hbm_to_vmem [thread:$0]  %s786_s2, 2048, %s29_s8, [#allocation5], %s637_s0, %s637_s0, %s638_s17  }
  0x1b   :  { %s639_s20 = smov [#allocation9]   ;;  %s530_s24 = scalar_lea.hbm %s788_s4, 2048 }
  0x1c   :  { %s42_s21 = sshll.u32 %s639_s20, 4  ;;  %p531_p11 = scmp.ne.s32.totalorder %s788_s4, %s530_s24  ;;  %s43_s21 = int_to_ptr.vmem [resolvable:$true] %s42_s21 }
  0x1d   :  { %p534_p12 = scmp.lt.u32.totalorder %s530_s24, %s788_s4 }
  0x1f   :  { %p536_p13 = pnand %p534_p12, %p531_p11 }
  0x21   :  { %539 = shalt.err (!%p536_p13)
}
  0x22   :  { %s540_s29 = scalar_lea.vmem %s43_s21, 2048  ;;  %p545_p1 = scmp.lt.s32.totalorder %s43_s21, %s43_s21 }
  0x23   :  { %p541_p0 = scmp.ne.s32.totalorder %s43_s21, %s540_s29  ;;  %p546_p2 = scmp.lt.s32.totalorder %s540_s29, %s540_s29 }
  0x25   :  { %p547_p3 = por %p546_p2, %p545_p1 }
  0x27   :  { %p548_p4 = pnand %p547_p3, %p541_p0 }
  0x29   :  { %551 = shalt.err (!%p548_p4)
}
  0x2a   :  { %48 = dma.hbm_to_vmem [thread:$0]  %s788_s4, 2048, %s43_s21, [#allocation10], %s637_s0, %s637_s0, %s638_s17  }
  0x2b   :  { %623 = dma.done.wait [#allocation7], 16  }
  0x2c   :  { %624 = vsyncadd [#allocation7], 4294967280 }
  0x2d   :  { %625 = dma.done.wait [#allocation5], 2048  }
  0x2e   :  { %626 = vsyncadd [#allocation5], 4294965248 }
  0x2f   :  { %627 = dma.done.wait [#allocation10], 2048  }
  0x30   :  { %628 = vsyncadd [#allocation10], 4294965248 }
  0x31   :  { %60 = sfence }
  0x32   :  { %s62_s7 = sld [smem:[#allocation4]]  ;;  %s717_s8 = sld [smem:[#allocation4 + $0x1]] }
  0x33   :  { %s640_s9 = smov [#allocation2]   ;;  %s641_s11 = smov [#allocation2 + $0x1]  }
  0x34   :  { %s74_s10 = sshll.u32 %s640_s9, 4  ;;  %s93_s12 = sshll.u32 %s641_s11, 4  ;;  %s719_s10 = int_to_ptr.vmem [resolvable:$true] %s74_s10  ;;  %s721_s12 = int_to_ptr.vmem [resolvable:$true] %s93_s12 }
  0x35   :  { %s554_s19 = scalar_lea.hbm %s785_s1, 256 }
  0x38   :  { %s326_s13 = sshll.u32 %s62_s7, 4  ;;  %s328_s16 = sshll.u32 %s717_s8, 4 }
  0x39   :  { %s66_s15 = scalar_lea.hbm %s785_s1, %s326_s13 }
  0x3a   :  { %s552_s0 = scalar_lea.hbm %s66_s15, 16  ;;  %p555_p6 = scmp.lt.u32.totalorder %s66_s15, %s785_s1 }
  0x3b   :  { %p553_p5 = scmp.ne.s32.totalorder %s66_s15, %s552_s0  ;;  %p556_p7 = scmp.lt.u32.totalorder %s554_s19, %s552_s0 }
  0x3c   :  { %p558_p9 = scmp.lt.u32.totalorder %s552_s0, %s66_s15 }
  0x3d   :  { %p557_p8 = por %p556_p7, %p555_p6 }
  0x3f   :  { %p559_p10 = por %p558_p9, %p557_p8 }
  0x41   :  { %p560_p11 = pnand %p559_p10, %p553_p5 }
  0x43   :  { %563 = shalt.err (!%p560_p11)  }
  0x44   :  { %s564_s22 = scalar_lea.vmem %s719_s10, 16  ;;  %s568_s23 = scalar_lea.vmem %s719_s10, 32 }
  0x45   :  { %p565_p12 = scmp.ne.s32.totalorder %s719_s10, %s564_s22  ;;  %p569_p13 = scmp.lt.s32.totalorder %s719_s10, %s719_s10 }
  0x46   :  { %p570_p0 = scmp.lt.s32.totalorder %s568_s23, %s564_s22 }
  0x48   :  { %p571_p1 = por %p570_p0, %p569_p13 }
  0x4a   :  { %p572_p2 = pnand %p571_p1, %p565_p12 }
  0x4c   :  { %575 = shalt.err (!%p572_p2)  }
  0x4d   :  { %77 = dma.hbm_to_vmem [thread:$0]  %s66_s15, 16, %s719_s10, [#allocation3] }
  0x4e   :  { %s324_s26 = scalar_lea.hbm %s785_s1, %s328_s16 }
  0x4f   :  { %s325_s27 = scalar_lea.hbm %s324_s26, 128  ;;  %s600_s28 = scalar_lea.hbm %s324_s26, 144 }
  0x50   :  { %p577_p3 = scmp.ne.s32.totalorder %s325_s27, %s600_s28  ;;  %p579_p4 = scmp.lt.u32.totalorder %s325_s27, %s785_s1 }
  0x51   :  { %p580_p5 = scmp.lt.u32.totalorder %s554_s19, %s600_s28  ;;  %p582_p7 = scmp.lt.u32.totalorder %s600_s28, %s325_s27 }
  0x53   :  { %p581_p6 = por %p580_p5, %p579_p4 }
  0x55   :  { %p583_p8 = por %p582_p7, %p581_p6 }
  0x57   :  { %p584_p9 = pnand %p583_p8, %p577_p3 }
  0x59   :  { %587 = shalt.err (!%p584_p9)  }
  0x5a   :  { %s588_s30 = scalar_lea.vmem %s721_s12, 16  ;;  %p593_p11 = scmp.lt.s32.totalorder %s721_s12, %s719_s10 }
  0x5b   :  { %p589_p10 = scmp.ne.s32.totalorder %s721_s12, %s588_s30  ;;  %p594_p12 = scmp.lt.s32.totalorder %s568_s23, %s588_s30 }
  0x5d   :  { %p595_p13 = por %p594_p12, %p593_p11 }
  0x5f   :  { %p596_p0 = pnand %p595_p13, %p589_p10 }
  0x61   :  { %599 = shalt.err (!%p596_p0)  }
  0x62   :  { %96 = dma.hbm_to_vmem [thread:$0]  %s325_s27, 16, %s721_s12, [#allocation3 + $0x1] }
  0x63   :  { %629 = dma.done.wait [#allocation3], 16 }
  0x64   :  { %630 = vsyncadd [#allocation3], 4294967280 }
  0x65   :  { %631 = dma.done.wait [#allocation3 + $0x1], 16 }
  0x66   :  { %632 = vsyncadd [#allocation3 + $0x1], 4294967280  ;;  %v642_v0 = vmov 0.0|0.0   ;;  %vm643_vm0 = vmmov 0   ;;  %v644_v1 = vmov 0.0   ;;  %v103_v2 = vld [vmem:[#allocation8] sm:$0xff] }
  0x67   :  { %437 = vmatprep.subr.bf16.mxu0 %v642_v0  ;;  %399 = vmatprep.mubr.msk.f32.mxu0 %vm643_vm0, %v644_v1  ;;  %v104_v3 = vld [vmem:[#allocation8 + $0x8] sm:$0xff]  ;;  %v105_v4 = vld [vmem:[#allocation8 + $0x10] sm:$0xff]  ;;  %v106_v6 = vld [vmem:[#allocation8 + $0x18] sm:$0xff]  ;;  %s645_s10 = smov [#allocation11]  }
  0x68   :  { %461 = vmatprep.subr.bf16.mxu1 %v642_v0  ;;  %434 = vmatprep.mubr.msk.f32.mxu1 %vm643_vm0, %v644_v1  ;;  %v438_v5 = vpack.c.bf16 %v104_v3, %v103_v2  ;;  %v441_v7 = vpack.c.bf16 %v106_v6, %v105_v4  ;;  %v107_v8 = vld [vmem:[#allocation8 + $0x20] sm:$0xff]  ;;  %v108_v9 = vld [vmem:[#allocation8 + $0x28] sm:$0xff]  ;;  %v199_v12 = vld [vmem:[#allocation9 + $0x10] sm:$0xff]  ;;  %s297_s11 = sshll.u32 %s645_s10, 4  ;;  %s298_s11 = int_to_ptr.vmem [resolvable:$true] %s297_s11 }
  0x69   :  { %v197_v10 = vld [vmem:[#allocation9] sm:$0xff]  ;;  %v198_v11 = vld [vmem:[#allocation9 + $0x8] sm:$0xff]  ;;  %v200_v13 = vld [vmem:[#allocation9 + $0x18] sm:$0xff]  ;;  %v444_v14 = vpack.c.bf16 %v108_v9, %v107_v8  ;;  %s601_s12 = scalar_lea.vmem %s298_s11, 32  ;;  %p606_p2 = scmp.lt.s32.totalorder %s298_s11, %s298_s11 }
  0x6a   :  { %439 = vmatpush3.bf16.msra.mxu0 %v438_v5  ;;  %v462_v15 = vpack.c.bf16 %v198_v11, %v197_v10  ;;  %v109_v16 = vld [vmem:[#allocation8 + $0x30] sm:$0xff]  ;;  %v110_v17 = vld [vmem:[#allocation8 + $0x38] sm:$0xff]  ;;  %v465_v18 = vpack.c.bf16 %v200_v13, %v199_v12  ;;  %v201_v19 = vld [vmem:[#allocation9 + $0x20] sm:$0xff]  ;;  %p602_p1 = scmp.ne.s32.totalorder %s298_s11, %s601_s12  ;;  %p607_p3 = scmp.lt.s32.totalorder %s601_s12, %s601_s12 }
  0x6b   :  { %440 = vmatprep.subr.bf16.mxu0 %v642_v0  ;;  %v202_v20 = vld [vmem:[#allocation9 + $0x28] sm:$0xff]  ;;  %v447_v21 = vpack.c.bf16 %v110_v17, %v109_v16  ;;  %v111_v22 = vld [vmem:[#allocation8 + $0x40] sm:$0xff]  ;;  %v203_v25 = vld [vmem:[#allocation9 + $0x30] sm:$0xff] }
  0x6c   :  { %463 = vmatpush3.bf16.msra.mxu1 %v462_v15  ;;  %v112_v23 = vld [vmem:[#allocation8 + $0x48] sm:$0xff]  ;;  %v468_v24 = vpack.c.bf16 %v202_v20, %v201_v19  ;;  %v204_v26 = vld [vmem:[#allocation9 + $0x38] sm:$0xff]  ;;  %v113_v28 = vld [vmem:[#allocation8 + $0x50] sm:$0xff]  ;;  %p608_p4 = por %p607_p3, %p606_p2 }
  0x6d   :  { %464 = vmatprep.subr.bf16.mxu1 %v642_v0  ;;  %v450_v27 = vpack.c.bf16 %v112_v23, %v111_v22  ;;  %v114_v29 = vld [vmem:[#allocation8 + $0x58] sm:$0xff]  ;;  %v471_v30 = vpack.c.bf16 %v204_v26, %v203_v25  ;;  %v205_v31 = vld [vmem:[#allocation9 + $0x40] sm:$0xff]  ;;  %v206_v32 = vld [vmem:[#allocation9 + $0x48] sm:$0xff] }
  0x6e   :  { %442 = vmatpush3.bf16.msra.mxu0 %v441_v7  ;;  %v453_v33 = vpack.c.bf16 %v114_v29, %v113_v28  ;;  %v115_v34 = vld [vmem:[#allocation8 + $0x60] sm:$0xff]  ;;  %v116_v35 = vld [vmem:[#allocation8 + $0x68] sm:$0xff]  ;;  %v474_v36 = vpack.c.bf16 %v206_v32, %v205_v31  ;;  %v117_v38 = vld [vmem:[#allocation8 + $0x70] sm:$0xff]  ;;  %p609_p5 = pnand %p608_p4, %p602_p1 }
  0x6f   :  { %443 = vmatprep.subr.bf16.mxu0 %v642_v0  ;;  %v456_v37 = vpack.c.bf16 %v116_v35, %v115_v34  ;;  %v118_v39 = vld [vmem:[#allocation8 + $0x78] sm:$0xff]  ;;  %v207_v42 = vld [vmem:[#allocation9 + $0x50] sm:$0xff]  ;;  %v209_v45 = vld [vmem:[#allocation9 + $0x60] sm:$0xff] }
  0x70   :  { %466 = vmatpush3.bf16.msra.mxu1 %v465_v18  ;;  %v459_v40 = vpack.c.bf16 %v118_v39, %v117_v38  ;;  %v102_v41 = vld [vmem:[#allocation2] sm:$0x3]  ;;  %v210_v46 = vld [vmem:[#allocation9 + $0x68] sm:$0xff]  ;;  %v211_v48 = vld [vmem:[#allocation9 + $0x70] sm:$0xff] }
  0x71   :  { %467 = vmatprep.subr.bf16.mxu1 %v642_v0  ;;  %v208_v43 = vld [vmem:[#allocation9 + $0x58] sm:$0xff]  ;;  %v480_v47 = vpack.c.bf16 %v210_v46, %v209_v45 }
  0x72   :  { %445 = vmatpush3.bf16.msra.mxu0 %v444_v14  ;;  %v477_v44 = vpack.c.bf16 %v208_v43, %v207_v42  ;;  %v212_v49 = vld [vmem:[#allocation9 + $0x78] sm:$0xff] }
  0x73   :  { %446 = vmatprep.subr.bf16.mxu0 %v642_v0  ;;  %v483_v50 = vpack.c.bf16 %v212_v49, %v211_v48  ;;  %v329_v51 = vld [vmem:[%s787_s3] ss:$0 sm:$0xff] }
  0x74   :  { %469 = vmatpush3.bf16.msra.mxu1 %v468_v24  ;;  %v330_v56 = vld [vmem:[%s789_s5] ss:$0 sm:$0xff] }
  0x75   :  { %470 = vmatprep.subr.bf16.mxu1 %v642_v0 }
  0x76   :  { %448 = vmatpush3.bf16.msra.mxu0 %v447_v21 }
  0x77   :  { %449 = vmatprep.subr.bf16.mxu0 %v642_v0 }
  0x78   :  { %472 = vmatpush3.bf16.msra.mxu1 %v471_v30 }
  0x79   :  { %473 = vmatprep.subr.bf16.mxu1 %v642_v0 }
  0x7a   :  { %451 = vmatpush3.bf16.msra.mxu0 %v450_v27 }
  0x7b   :  { %452 = vmatprep.subr.bf16.mxu0 %v642_v0 }
  0x7c   :  { %475 = vmatpush3.bf16.msra.mxu1 %v474_v36 }
  0x7d   :  { %476 = vmatprep.subr.bf16.mxu1 %v642_v0 }
  0x7e   :  { %454 = vmatpush3.bf16.msra.mxu0 %v453_v33 }
  0x7f   :  { %455 = vmatprep.subr.bf16.mxu0 %v642_v0 }
  0x80   :  { %478 = vmatpush3.bf16.msra.mxu1 %v477_v44 }
  0x81   :  { %479 = vmatprep.subr.bf16.mxu1 %v642_v0 }
  0x82   :  { %457 = vmatpush3.bf16.msra.mxu0 %v456_v37 }
  0x83   :  { %458 = vmatprep.subr.bf16.mxu0 %v642_v0 }
  0x84   :  { %481 = vmatpush3.bf16.msra.mxu1 %v480_v47 }
  0x85   :  { %482 = vmatprep.subr.bf16.mxu1 %v642_v0 }
  0x86   :  { %460 = vmatpush3.bf16.msra.mxu0 %v459_v40 }
  0x88   :  { %484 = vmatpush3.bf16.msra.mxu1 %v483_v50 }
  0x89   :  { %400 = vmatmul.mubr.f32.vlgmr.msra.gmra.mrb[0].mxu0 %v102_v41 }
 0x15c   :  { %v192_v52 = vpop.f32.mrb[0].mxu0 }
 0x15d   :  { %v193_v53 = vadd.f32 %v329_v51, %v192_v52  ;;  %v401_v54 = vpop.f32.mrb[1].mxu0 }
 0x15f   :  { %496 = vtanh.f32 %v193_v53 }
 0x169   :  { %v497_v55 = vpop.eup %496 }
 0x16a   :  { %435 = vmatmul.mubr.f32.vlgmr.msra.gmra.mrb[0].mxu1 %v497_v55 }
 0x23d   :  { %v286_v57 = vpop.f32.mrb[0].mxu1 }
 0x23e   :  { %v287_v58 = vadd.f32 %v330_v56, %v286_v57  ;;  %v436_v59 = vpop.f32.mrb[1].mxu1 }
 0x240   :  { %290 = vst [vmem:[#allocation11] sm:$0x3] %v287_v58 }
 0x241   :  { %612 = shalt.err (!%p609_p5)
}
 0x242   :  { %s613_s4 = scalar_lea.hbm %s790_s6, 32 }
 0x243   :  { %p614_p6 = scmp.ne.s32.totalorder %s790_s6, %s613_s4  ;;  %p617_p7 = scmp.lt.u32.totalorder %s613_s4, %s790_s6 }
 0x245   :  { %p619_p8 = pnand %p617_p7, %p614_p6 }
 0x247   :  { %622 = shalt.err (!%p619_p8)
}
 0x248   :  { %300 = dma.vmem_to_hbm [thread:$0]  %s298_s11, 32, %s790_s6, [#allocation6]  }
 0x249   :  { %633 = dma.done.wait [#allocation6], 32  }
 0x24a   :  { %634 = vsyncadd [#allocation6], 4294967264 }
 0x24b   :  { %304 = vsyncpa [#allocation5], 1 }
 0x24c   :  { %305 = vsyncpa [#allocation10], 1 }
 0x24d   :  { %306 = vsyncpa [#allocation6], 1 }
 0x24e   :  { %307 = vsyncpa [#allocation7], 1 }
 0x24f   :  { %308 = vsyncmov [#allocation3] }
 0x252   :  { %s309_s18 = vpop.sfrf %308 }
 0x253   :  { %p331_p9 = scmp.ne.s32.totalorder %s309_s18, 0 }
 0x255   :  { %313 = shalt.err (%p331_p9)  }
 0x256   :  { %315 = vsyncmov [#allocation3 + $0x1] }
 0x259   :  { %s316_s19 = vpop.sfrf %315 }
 0x25a   :  { %p332_p10 = scmp.ne.s32.totalorder %s316_s19, 0 }
 0x25c   :  { %320 = shalt.err (%p332_p10)  }

</bundles_post_ra>
